<compile_context>
chip_gen: v6e
topology: v6e:2x2x1
jax: 0.10.0
libtpu: 0.0.40
codegen_flags: <defaults>
</compile_context>

<pallas_src>
import functools
import math

import jax
import jax.numpy as jnp
from jax.experimental import pallas as pl
from jax.experimental.pallas import tpu as pltpu


def _round_up(x: int, m: int) -> int:
    return (x + m - 1) // m * m


_MiB = 1024 * 1024

# Per-generation (tm, th, vmem_limit) defaults, per the optimization review.
_TILE_DEFAULTS = {
    "v5e": dict(tm=256, th=1024, vmem=96 * _MiB),
    "v6e": dict(tm=512, th=512, vmem=100 * _MiB),
    "v7x": dict(tm=256, th=256, vmem=48 * _MiB),
    None: dict(tm=256, th=512, vmem=64 * _MiB),   # unknown chip: previous known-good config
}


def _tpu_generation():
    try:
        kind = jax.devices()[0].device_kind.lower()
    except Exception:
        return None
    if "v5 lite" in kind or "v5e" in kind or "v5lite" in kind:
        return "v5e"
    if "v6" in kind:
        return "v6e"
    if "7x" in kind or "v7" in kind:
        return "v7x"
    return None


# ----------------------------------------------------------------------------
# Kernels
# ----------------------------------------------------------------------------
def _swiglu_kernel_acc(x_ref, w13_ref, b13_ref, w2_ref, b2_ref, o_ref, acc_ref, *, th):
    """Variant with an f32 VMEM scratch accumulator (for non-f32 output dtypes)."""
    h = pl.program_id(1)

    @pl.when(h == 0)
    def _():
        acc_ref[...] = jnp.zeros_like(acc_ref)

    x = x_ref[...]                                                     # (tm, d_pad) bf16
    h13 = jnp.dot(x, w13_ref[...], preferred_element_type=jnp.float32) + b13_ref[...]
    h1 = h13[:, :th]                                                   # (tm, th) f32
    h3 = h13[:, th:]                                                   # (tm, th) f32
    g = (h1 * jax.nn.sigmoid(h1)) * h3                                 # SiLU gate in f32
    acc_ref[...] += jnp.dot(g.astype(w2_ref.dtype), w2_ref[...],
                            preferred_element_type=jnp.float32)

    @pl.when(h == pl.num_programs(1) - 1)
    def _():
        o_ref[...] = (acc_ref[...] + b2_ref[...]).astype(o_ref.dtype)


def _swiglu_kernel_f32out(x_ref, w13_ref, b13_ref, w2_ref, b2_ref, o_ref, *, th):
    """Variant that accumulates directly into the f32 output block (no scratch)."""
    h = pl.program_id(1)

    x = x_ref[...]                                                     # (tm, d_pad) bf16
    h13 = jnp.dot(x, w13_ref[...], preferred_element_type=jnp.float32) + b13_ref[...]
    h1 = h13[:, :th]
    h3 = h13[:, th:]
    g = (h1 * jax.nn.sigmoid(h1)) * h3
    part = jnp.dot(g.astype(w2_ref.dtype), w2_ref[...],
                   preferred_element_type=jnp.float32)

    @pl.when(h == 0)
    def _():
        o_ref[...] = part + b2_ref[...]

    @pl.when(h != 0)
    def _():
        o_ref[...] = o_ref[...] + part


# ----------------------------------------------------------------------------
# One-time weight packing (hoisted out of the per-call hot path)
# ----------------------------------------------------------------------------
def pack_swiglu_params(w1, b1, w3, b3, w2, b2, *, tm=None, th=None,
                       vmem_limit_bytes=None):
    """Pad / interleave / bf16-cast the SwiGLU weights ONCE.

    w1, w3: (dim, hidden); w2: (hidden, dim); b1, b3: (hidden,); b2: (dim,).
    Returns a dict consumed by swiglu_apply().
    """
    dim, hidden = w1.shape
    cfg = _TILE_DEFAULTS.get(_tpu_generation(), _TILE_DEFAULTS[None])
    tm = int(tm) if tm is not None else cfg["tm"]
    th = int(th) if th is not None else cfg["th"]
    vmem = int(vmem_limit_bytes) if vmem_limit_bytes is not None else cfg["vmem"]

    # Feature axis: lane-dense, 256-aligned when large (full 2x256x256 MXU passes).
    d_pad = 128 if dim <= 128 else _round_up(dim, 256)
    # Hidden axis: 256-aligned tiles when possible (clean h1|h3 split boundaries).
    h_base = _round_up(hidden, 128)
    th_eff = min(_round_up(th, 256), h_base)
    h_pad = _round_up(h_base, th_eff)
    n_h = h_pad // th_eff

    bf16, f32 = jnp.bfloat16, jnp.float32

    # Pad directly in the matmul operand dtype (no f32 padded copies).
    w1b = jnp.pad(w1.astype(bf16), ((0, d_pad - dim), (0, h_pad - hidden)))
    w3b = jnp.pad(w3.astype(bf16), ((0, d_pad - dim), (0, h_pad - hidden)))
    w2b = jnp.pad(w2.astype(bf16), ((0, h_pad - hidden), (0, d_pad - dim)))
    b1p = jnp.pad(b1.astype(f32), (0, h_pad - hidden))
    b3p = jnp.pad(b3.astype(f32), (0, h_pad - hidden))
    b2p = jnp.pad(b2.astype(f32), (0, d_pad - dim)).reshape(1, d_pad)

    # Interleave w1/w3 per hidden tile: columns [h*2*th, h*2*th+th) -> w1 tile,
    # [h*2*th+th, (h+1)*2*th) -> w3 tile.
    w13 = jnp.stack([w1b.reshape(d_pad, n_h, th_eff),
                     w3b.reshape(d_pad, n_h, th_eff)], axis=2).reshape(d_pad, 2 * h_pad)
    b13 = jnp.stack([b1p.reshape(n_h, th_eff),
                     b3p.reshape(n_h, th_eff)], axis=1).reshape(1, 2 * h_pad)

    return dict(w13=w13, b13=b13, w2=w2b, b2=b2p,
                dim=dim, hidden=hidden, d_pad=d_pad, h_pad=h_pad,
                th=th_eff, n_h=n_h, tm=tm, vmem_limit_bytes=vmem)


# ----------------------------------------------------------------------------
# Hot-path forward
# ----------------------------------------------------------------------------
def swiglu_apply(x, p):
    """SwiGLU forward with pre-packed params. x: (..., dim)."""
    dim, d_pad, th, n_h = p["dim"], p["d_pad"], p["th"], p["n_h"]
    lead = x.shape[:-1]
    N = int(math.prod(lead)) if lead else 1
    out_dtype = x.dtype

    # Row tile: 16-aligned (bf16 packs 2 rows per sublane), clamped for tiny N.
    tm_eff = max(16, min(p["tm"], _round_up(N, 16)))
    n_pad = _round_up(N, tm_eff)

    # Stage activations directly in bf16, pad only if needed.
    x2 = x.reshape(N, dim).astype(jnp.bfloat16)
    if (n_pad, d_pad) != (N, dim):
        x2 = jnp.pad(x2, ((0, n_pad - N), (0, d_pad - dim)))

    in_specs = [
        pl.BlockSpec((tm_eff, d_pad), lambda i, h: (i, 0)),        # x rows tile
        pl.BlockSpec((d_pad, 2 * th), lambda i, h: (0, h)),        # [w1|w3] hidden tile
        pl.BlockSpec((1, 2 * th), lambda i, h: (0, h)),            # [b1|b3] hidden tile
        pl.BlockSpec((th, d_pad), lambda i, h: (h, 0)),            # w2 hidden tile
        pl.BlockSpec((1, d_pad), lambda i, h: (0, 0)),             # b2
    ]
    out_spec = pl.BlockSpec((tm_eff, d_pad), lambda i, h: (i, 0))

    if out_dtype == jnp.float32:
        # Accumulate straight into the resident f32 output block (no scratch).
        kernel = functools.partial(_swiglu_kernel_f32out, th=th)
        scratch = []
    else:
        kernel = functools.partial(_swiglu_kernel_acc, th=th)
        scratch = [pltpu.VMEM((tm_eff, d_pad), jnp.float32)]

    out2 = pl.pallas_call(
        kernel,
        out_shape=jax.ShapeDtypeStruct((n_pad, d_pad), out_dtype),
        grid_spec=pltpu.PrefetchScalarGridSpec(
            num_scalar_prefetch=0,
            grid=(n_pad // tm_eff, n_h),
            in_specs=in_specs,
            out_specs=out_spec,
            scratch_shapes=scratch),
        compiler_params=pltpu.CompilerParams(
            dimension_semantics=("parallel", "arbitrary"),
            vmem_limit_bytes=p["vmem_limit_bytes"]),
    )(x2, p["w13"], p["b13"], p["w2"], p["b2"])

    return out2[:N, :dim].reshape(*lead, dim)


def swiglu(x, w1, b1, w3, b3, w2, b2, **kwargs):
    """Convenience one-shot wrapper (packs weights each call; prefer pack+apply)."""
    return swiglu_apply(x, pack_swiglu_params(w1, b1, w3, b3, w2, b2, **kwargs))


# ----------------------------------------------------------------------------
# Reference / test
# ----------------------------------------------------------------------------
def init_linear(key, in_f, out_f):
    """Mimic nn.Linear init: U(-1/sqrt(in), 1/sqrt(in)). Weight returned as (in_f, out_f)."""
    kw, kb = jax.random.split(key)
    bound = 1.0 / math.sqrt(in_f)
    w = jax.random.uniform(kw, (in_f, out_f), jnp.float32, -bound, bound)
    b = jax.random.uniform(kb, (out_f,), jnp.float32, -bound, bound)
    return w, b


def swiglu_ref(x, w1, b1, w3, b3, w2, b2, mm_dtype=jnp.float32):
    """Pure-JAX reference; mm_dtype selects matmul operand precision (f32 accumulation)."""
    xc = x.astype(mm_dtype)
    h1 = jnp.dot(xc, w1.astype(mm_dtype), preferred_element_type=jnp.float32) + b1
    h3 = jnp.dot(xc, w3.astype(mm_dtype), preferred_element_type=jnp.float32) + b3
    g = jax.nn.silu(h1) * h3
    return jnp.dot(g.astype(mm_dtype), w2.astype(mm_dtype),
                   preferred_element_type=jnp.float32) + b2


if __name__ == "__main__":
    key = jax.random.PRNGKey(0)
    B, S, dim, hidden = 2, 8, 32, 64

    k_x, k1, k2, k3 = jax.random.split(key, 4)
    x = jax.random.normal(k_x, (B, S, dim), jnp.float32)

    w1, b1 = init_linear(k1, dim, hidden)     # nn.Linear(dim, hidden)
    w3, b3 = init_linear(k3, dim, hidden)     # nn.Linear(dim, hidden)
    w2, b2 = init_linear(k2, hidden, dim)     # nn.Linear(hidden, dim)

    # Pack weights once (out of the per-call hot path), then run the forward.
    packed = pack_swiglu_params(w1, b1, w3, b3, w2, b2)
    out = swiglu_apply(x, packed)
    out = jax.block_until_ready(out)

    # Reference with the same bf16 matmul-operand precision (f32 accumulation).
    ref_bf16 = swiglu_ref(x, w1, b1, w3, b3, w2, b2, mm_dtype=jnp.bfloat16)
    # Full-f32 reference as a coarse sanity check on overall scale.
    ref_f32 = swiglu_ref(x, w1, b1, w3, b3, w2, b2, mm_dtype=jnp.float32)

    assert out.shape == (B, S, dim)
    assert jnp.allclose(out, ref_bf16, atol=1e-2, rtol=1e-2), "mismatch vs bf16 reference"
    assert jnp.allclose(out, ref_f32, atol=1e-1, rtol=1e-1), "mismatch vs f32 reference"

    print("KERNEL_OK")
</pallas_src>

<mosaic_0001>
module attributes {stable_mosaic.version = 11 : i64} {
  func.func @_swiglu_kernel_f32out(%arg0: i32, %arg1: i32, %arg2: memref<16x128xbf16, #tpu.memory_space<vmem>>, %arg3: memref<128x256xbf16, #tpu.memory_space<vmem>>, %arg4: memref<1x256xf32, #tpu.memory_space<vmem>>, %arg5: memref<128x128xbf16, #tpu.memory_space<vmem>>, %arg6: memref<1x128xf32, #tpu.memory_space<vmem>>, %arg7: memref<16x128xf32, #tpu.memory_space<vmem>>) attributes {dimension_semantics = [#tpu.dimension_semantics<parallel>, #tpu.dimension_semantics<arbitrary>], iteration_bounds = array<i64: 1, 1>, scalar_prefetch = 0 : i64, scratch_operands = 0 : i64, tpu.core_type = #tpu.core_type<tc>, window_params = [{transform_indices = @transform_0, window_bounds = array<i64: 16, 128>}, {transform_indices = @transform_1, window_bounds = array<i64: 128, 256>}, {transform_indices = @transform_2, window_bounds = array<i64: 1, 256>}, {transform_indices = @transform_3, window_bounds = array<i64: 128, 128>}, {pipeline_mode = #tpu.pipeline_mode<synchronous>, transform_indices = @transform_4, window_bounds = array<i64: 1, 128>}, {transform_indices = @transform_5, window_bounds = array<i64: 16, 128>}]} {
    %c0 = arith.constant 0 : index
    %c0_0 = arith.constant 0 : index
    %0 = vector.load %arg2[%c0, %c0_0] : memref<16x128xbf16, #tpu.memory_space<vmem>>, vector<16x128xbf16>
    %c0_1 = arith.constant 0 : index
    %c0_2 = arith.constant 0 : index
    %1 = vector.load %arg3[%c0_1, %c0_2] : memref<128x256xbf16, #tpu.memory_space<vmem>>, vector<128x256xbf16>
    %cst = arith.constant dense<0.000000e+00> : vector<16x256xf32>
    %2 = tpu.matmul %0, %1, %cst {dimension_numbers = #tpu.dot_dimension_numbers<[1], [0], [0], [1], [0, 0, 1, 1], [], []>} : vector<16x128xbf16>, vector<128x256xbf16>, vector<16x256xf32> -> vector<16x256xf32>
    %c0_3 = arith.constant 0 : index
    %c0_4 = arith.constant 0 : index
    %3 = vector.load %arg4[%c0_3, %c0_4] : memref<1x256xf32, #tpu.memory_space<vmem>>, vector<1x256xf32>
    %4 = vector.broadcast %3 : vector<1x256xf32> to vector<16x256xf32>
    %5 = arith.addf %2, %4 : vector<16x256xf32>
    %6 = vector.extract_strided_slice %5 {offsets = [0, 0], sizes = [16, 128], strides = [1, 1]} : vector<16x256xf32> to vector<16x128xf32>
    %7 = vector.extract_strided_slice %5 {offsets = [0, 128], sizes = [16, 128], strides = [1, 1]} : vector<16x256xf32> to vector<16x128xf32>
    %8 = arith.negf %6 : vector<16x128xf32>
    %9 = math.exp %8 : vector<16x128xf32>
    %cst_5 = arith.constant 1.000000e+00 : f32
    %10 = vector.broadcast %cst_5 : f32 to vector<16x128xf32>
    %11 = arith.addf %10, %9 : vector<16x128xf32>
    %12 = arith.divf %10, %11 : vector<16x128xf32>
    %13 = arith.mulf %6, %12 : vector<16x128xf32>
    %14 = arith.mulf %13, %7 : vector<16x128xf32>
    %15 = arith.truncf %14 : vector<16x128xf32> to vector<16x128xbf16>
    %c0_6 = arith.constant 0 : index
    %c0_7 = arith.constant 0 : index
    %16 = vector.load %arg5[%c0_6, %c0_7] : memref<128x128xbf16, #tpu.memory_space<vmem>>, vector<128x128xbf16>
    %cst_8 = arith.constant dense<0.000000e+00> : vector<16x128xf32>
    %17 = tpu.matmul %15, %16, %cst_8 {dimension_numbers = #tpu.dot_dimension_numbers<[1], [0], [0], [1], [0, 0, 1, 1], [], []>} : vector<16x128xbf16>, vector<128x128xbf16>, vector<16x128xf32> -> vector<16x128xf32>
    %c0_i32 = arith.constant 0 : i32
    %18 = arith.cmpi eq, %arg1, %c0_i32 : i32
    %19 = arith.extui %18 : i1 to i32
    %c0_i32_9 = arith.constant 0 : i32
    %20 = arith.cmpi ne, %19, %c0_i32_9 : i32
    scf.if %20 {
      %c0_12 = arith.constant 0 : index
      %c0_13 = arith.constant 0 : index
      %24 = vector.load %arg6[%c0_12, %c0_13] : memref<1x128xf32, #tpu.memory_space<vmem>>, vector<1x128xf32>
      %25 = vector.broadcast %24 : vector<1x128xf32> to vector<16x128xf32>
      %26 = arith.addf %17, %25 : vector<16x128xf32>
      %c0_14 = arith.constant 0 : index
      %c0_15 = arith.constant 0 : index
      %27 = vector.load %arg7[%c0_14, %c0_15] : memref<16x128xf32, #tpu.memory_space<vmem>>, vector<16x128xf32>
      tpu.vector_store %arg7[%c0_14, %c0_15], %26 {strides = array<i32>} : memref<16x128xf32, #tpu.memory_space<vmem>>, vector<16x128xf32>,
    } else {
    }
    %c0_i32_10 = arith.constant 0 : i32
    %21 = arith.cmpi ne, %arg1, %c0_i32_10 : i32
    %22 = arith.extui %21 : i1 to i32
    %c0_i32_11 = arith.constant 0 : i32
    %23 = arith.cmpi ne, %22, %c0_i32_11 : i32
    scf.if %23 {
      %c0_12 = arith.constant 0 : index
      %c0_13 = arith.constant 0 : index
      %24 = vector.load %arg7[%c0_12, %c0_13] : memref<16x128xf32, #tpu.memory_space<vmem>>, vector<16x128xf32>
      %25 = arith.addf %24, %17 : vector<16x128xf32>
      %c0_14 = arith.constant 0 : index
      %c0_15 = arith.constant 0 : index
      %26 = vector.load %arg7[%c0_14, %c0_15] : memref<16x128xf32, #tpu.memory_space<vmem>>, vector<16x128xf32>
      tpu.vector_store %arg7[%c0_14, %c0_15], %25 {strides = array<i32>} : memref<16x128xf32, #tpu.memory_space<vmem>>, vector<16x128xf32>,
    } else {
    }
    return
  }
  func.func @transform_0(%arg0: i32, %arg1: i32) -> (i32, i32) {
    %c0_i32 = arith.constant 0 : i32
    %c0_i32_0 = arith.constant 0 : i32
    return %arg0, %c0_i32 : i32, i32
  }
  func.func @transform_1(%arg0: i32, %arg1: i32) -> (i32, i32) {
    %c0_i32 = arith.constant 0 : i32
    %c0_i32_0 = arith.constant 0 : i32
    return %c0_i32, %arg1 : i32, i32
  }
  func.func @transform_2(%arg0: i32, %arg1: i32) -> (i32, i32) {
    %c0_i32 = arith.constant 0 : i32
    %c0_i32_0 = arith.constant 0 : i32
    return %c0_i32, %arg1 : i32, i32
  }
  func.func @transform_3(%arg0: i32, %arg1: i32) -> (i32, i32) {
    %c0_i32 = arith.constant 0 : i32
    %c0_i32_0 = arith.constant 0 : i32
    return %arg1, %c0_i32 : i32, i32
  }
  func.func @transform_4(%arg0: i32, %arg1: i32) -> (i32, i32) {
    %c0_i32 = arith.constant 0 : i32
    %c0_i32_0 = arith.constant 0 : i32
    %c0_i32_1 = arith.constant 0 : i32
    return %c0_i32, %c0_i32_0 : i32, i32
  }
  func.func @transform_5(%arg0: i32, %arg1: i32) -> (i32, i32) {
    %c0_i32 = arith.constant 0 : i32
    %c0_i32_0 = arith.constant 0 : i32
    return %arg0, %c0_i32 : i32, i32
  }
}

</mosaic_0001>

<bundles_post_ra>
// kernel: tpu_custom_call.1
= control target key start
LH: loop header
LB: loop body
LE: loop exit
PB: predicated region body
PF: predicated region fallthrough
CT: control target
= control target key end

     0   :  { %10 = vsyncpa [#allocation3], 0  ;;  %s647_s0 = inlined_call_operand.hbm [shape: bf16[16,128], index: 0, kind: input, shape index: {}]   ;;  %s648_s1 = inlined_call_operand.hbm [shape: bf16[128,256], index: 1, kind: input, shape index: {}]   ;;  %s649_s2 = inlined_call_operand.vmem [shape: f32[1,256], index: 2, kind: input, shape index: {}]   ;;  %s650_s3 = inlined_call_operand.hbm [shape: bf16[128,128], index: 3, kind: input, shape index: {}]   ;;  %s651_s4 = inlined_call_operand.vmem [shape: f32[1,128], index: 4, kind: input, shape index: {}]   ;;  %s652_s5 = inlined_call_operand.hbm [shape: f32[16,128], index: 5, kind: output, shape index: {}]  }
   0x1   :  { %11 = vsyncpa [#allocation6], 0 }
   0x2   :  { %12 = vsyncpa [#allocation4], 0  ;;  %s582_s18 = smov [#allocation5]  }
   0x3   :  { %s30_s19 = sshll.u32 %s582_s18, 4  ;;  %s31_s19 = int_to_ptr.vmem [resolvable:$true] %s30_s19 }
   0x4   :  { %s504_s20 = scalar_lea.vmem %s31_s19, 2048  ;;  %p509_p1 = scmp.lt.s32.totalorder %s31_s19, %s31_s19 }
   0x5   :  { %p505_p0 = scmp.ne.s32.totalorder %s31_s19, %s504_s20  ;;  %p510_p2 = scmp.lt.s32.totalorder %s504_s20, %s504_s20 }
   0x7   :  { %p511_p3 = por %p510_p2, %p509_p1 }
   0x9   :  { %p512_p4 = pnand %p511_p3, %p505_p0 }
   0xb   :  { %515 = shalt.err (!%p512_p4)
}
   0xc   :  { %s583_s21 = smov 128   ;;  %s584_s22 = smov 8  }
   0xd   :  { %36 = dma.hbm_to_vmem [thread:$0]  %s648_s1, 2048, %s31_s19, [#allocation6], %s583_s21, %s583_s21, %s584_s22  }
   0xe   :  { %s585_s25 = smov [#allocation2]  }
   0xf   :  { %s18_s26 = sshll.u32 %s585_s25, 4  ;;  %s19_s26 = int_to_ptr.vmem [resolvable:$true] %s18_s26 }
  0x10   :  { %s524_s27 = scalar_lea.vmem %s19_s26, 128  ;;  %p529_p6 = scmp.lt.s32.totalorder %s19_s26, %s19_s26 }
  0x11   :  { %p525_p5 = scmp.ne.s32.totalorder %s19_s26, %s524_s27  ;;  %p530_p7 = scmp.lt.s32.totalorder %s524_s27, %s524_s27 }
  0x13   :  { %p531_p8 = por %p530_p7, %p529_p6 }
  0x15   :  { %p532_p9 = pnand %p531_p8, %p525_p5 }
  0x17   :  { %535 = shalt.err (!%p532_p9)
}
  0x18   :  { %s586_s28 = smov 64   ;;  %s587_s29 = smov 4  }
  0x19   :  { %24 = dma.hbm_to_vmem [thread:$0]  %s647_s0, 128, %s19_s26, [#allocation3], %s586_s28, %s586_s28, %s587_s29  }
  0x1a   :  { %s588_s7 = smov [#allocation7]  }
  0x1b   :  { %s44_s8 = sshll.u32 %s588_s7, 4  ;;  %s45_s8 = int_to_ptr.vmem [resolvable:$true] %s44_s8 }
  0x1c   :  { %s544_s1 = scalar_lea.vmem %s45_s8, 1024  ;;  %p549_p11 = scmp.lt.s32.totalorder %s45_s8, %s45_s8 }
  0x1d   :  { %p545_p10 = scmp.ne.s32.totalorder %s45_s8, %s544_s1  ;;  %p550_p12 = scmp.lt.s32.totalorder %s544_s1, %s544_s1 }
  0x1f   :  { %p551_p13 = por %p550_p12, %p549_p11 }
  0x21   :  { %p552_p0 = pnand %p551_p13, %p545_p10 }
  0x23   :  { %555 = shalt.err (!%p552_p0)
}
  0x24   :  { %50 = dma.hbm_to_vmem [thread:$0]  %s650_s3, 1024, %s45_s8, [#allocation6], %s586_s28, %s586_s28, %s587_s29  }
  0x25   :  { %576 = dma.done.wait [#allocation3], 128  }
  0x26   :  { %577 = vsyncadd [#allocation3], 4294967168 }
  0x27   :  { %578 = dma.done.wait [#allocation6], 3072  }
  0x28   :  { %579 = vsyncadd [#allocation6], 4294964224  ;;  %v589_v0 = vmov 0   ;;  %v455_v1 = vld [vmem:[#allocation5 + $0x74] ss:$8 sps:$4 sm:$0xff]   ;;  %v590_v19 = vmov 0.0   ;;  %v83_v27 = vlaneseq }
  0x29   :  { %211 = vmatprep.mubr.bf16.mxu0 %v589_v0  ;;  %v457_v2 = vld [vmem:[#allocation5 + $0x70] ss:$8 sps:$4 sm:$0xff]   ;;  %179 = vmatprep.subr.bf16.mxu0 %v455_v1  ;;  %v458_v3 = vld [vmem:[#allocation5 + $0x64] ss:$8 sps:$4 sm:$0xff]   ;;  %v460_v4 = vld [vmem:[#allocation5 + $0x60] ss:$8 sps:$4 sm:$0xff]  }
  0x2a   :  { %180 = vmatpush1.bf16.msra.mxu0 %v457_v2  ;;  %v461_v5 = vld [vmem:[#allocation5 + $0x54] ss:$8 sps:$4 sm:$0xff]   ;;  %v463_v6 = vld [vmem:[#allocation5 + $0x50] ss:$8 sps:$4 sm:$0xff]   ;;  %v464_v7 = vld [vmem:[#allocation5 + $0x44] ss:$8 sps:$4 sm:$0xff]   ;;  %424 = vmatprep.subr.bf16.mxu1 %v590_v19 }
  0x2b   :  { %181 = vmatprep.subr.bf16.mxu0 %v458_v3  ;;  %v466_v8 = vld [vmem:[#allocation5 + $0x40] ss:$8 sps:$4 sm:$0xff]   ;;  %v467_v9 = vld [vmem:[#allocation5 + $0x34] ss:$8 sps:$4 sm:$0xff]   ;;  %v469_v10 = vld [vmem:[#allocation5 + $0x30] ss:$8 sps:$4 sm:$0xff]  }
  0x2c   :  { %v470_v11 = vld [vmem:[#allocation5 + $0x24] ss:$8 sps:$4 sm:$0xff]   ;;  %v472_v12 = vld [vmem:[#allocation5 + $0x20] ss:$8 sps:$4 sm:$0xff]   ;;  %v473_v13 = vld [vmem:[#allocation5 + $0x14] ss:$8 sps:$4 sm:$0xff]  }
  0x2d   :  { %v475_v14 = vld [vmem:[#allocation5 + $0x10] ss:$8 sps:$4 sm:$0xff]   ;;  %v476_v15 = vld [vmem:[#allocation5 + $0x4] ss:$8 sps:$4 sm:$0xff]   ;;  %v478_v16 = vld [vmem:[#allocation5] ss:$8 sps:$4 sm:$0xff]  }
  0x2e   :  { %182 = vmatpush1.bf16.msra.mxu0 %v460_v4  ;;  %v479_v17 = vld [vmem:[#allocation2] sm:$0xff]   ;;  %v481_v20 = vld [vmem:[#allocation7 + $0x30] sm:$0xff]   ;;  %v482_v21 = vld [vmem:[#allocation7 + $0x28] sm:$0xff]   ;;  %vm591_vm0 = vmmov 0   ;;  %v84_v28 = vshrl.u32 %v83_v27, 7  ;;  %s592_s12 = smov [#allocation8]  }
  0x2f   :  { %183 = vmatprep.subr.bf16.mxu0 %v461_v5  ;;  %v480_v18 = vld [vmem:[#allocation7 + $0x38] sm:$0xff]   ;;  %v483_v22 = vld [vmem:[#allocation7 + $0x20] sm:$0xff]   ;;  %v485_v24 = vld [vmem:[#allocation7 + $0x10] sm:$0xff]   ;;  %440 = vmatprep.mubr.msk.bf16.mxu1 %vm591_vm0, %v590_v19  ;;  %s374_s13 = sshll.u32 %s592_s12, 4  ;;  %s375_s13 = int_to_ptr.vmem [resolvable:$true] %s374_s13 }
  0x30   :  { %425 = vmatpush3.bf16.msra.mxu1 %v480_v18  ;;  %v484_v23 = vld [vmem:[#allocation7 + $0x18] sm:$0xff]   ;;  %v486_v25 = vld [vmem:[#allocation7 + $0x8] sm:$0xff]   ;;  %v487_v26 = vld [vmem:[#allocation7] sm:$0xff]   ;;  %v85_v29 = vsub.s32 0, %v84_v28  ;;  %v89_v43 = vsub.s32 1, %v84_v28  ;;  %s556_s14 = scalar_lea.vmem %s375_s13, 256  ;;  %p561_p2 = scmp.lt.s32.totalorder %s375_s13, %s375_s13 }
  0x31   :  { %426 = vmatprep.subr.bf16.mxu1 %v590_v19  ;;  %v81_v30 = vld [vmem:[%s649_s2] sm:$0x3]  ;;  %p557_p1 = scmp.ne.s32.totalorder %s375_s13, %s556_s14  ;;  %p562_p3 = scmp.lt.s32.totalorder %s556_s14, %s556_s14 }
  0x32   :  { %184 = vmatpush1.bf16.msra.mxu0 %v463_v6  ;;  %v86_v31 = vrot.slane %v81_v30, %v85_v29  ;;  %v90_v45 = vrot.slane %v81_v30, %v89_v43  ;;  %v414_v55 = vld [vmem:[%s651_s4] ss:$0 sm:$0xff] }
  0x33   :  { %185 = vmatprep.subr.bf16.mxu0 %v464_v7  ;;  %p563_p4 = por %p562_p3, %p561_p2 }
  0x34   :  { %427 = vmatpush3.bf16.msra.mxu1 %v481_v20 }
  0x35   :  { %428 = vmatprep.subr.bf16.mxu1 %v590_v19  ;;  %p564_p5 = pnand %p563_p4, %p557_p1 }
  0x36   :  { %186 = vmatpush1.bf16.msra.mxu0 %v466_v8 }
  0x37   :  { %187 = vmatprep.subr.bf16.mxu0 %v467_v9 }
  0x38   :  { %429 = vmatpush3.bf16.msra.mxu1 %v482_v21 }
  0x39   :  { %430 = vmatprep.subr.bf16.mxu1 %v590_v19 }
  0x3a   :  { %188 = vmatpush1.bf16.msra.mxu0 %v469_v10 }
  0x3b   :  { %189 = vmatprep.subr.bf16.mxu0 %v470_v11 }
  0x3c   :  { %431 = vmatpush3.bf16.msra.mxu1 %v483_v22 }
  0x3d   :  { %432 = vmatprep.subr.bf16.mxu1 %v590_v19 }
  0x3e   :  { %190 = vmatpush1.bf16.msra.mxu0 %v472_v12 }
  0x3f   :  { %191 = vmatprep.subr.bf16.mxu0 %v473_v13 }
  0x40   :  { %433 = vmatpush3.bf16.msra.mxu1 %v484_v23 }
  0x41   :  { %434 = vmatprep.subr.bf16.mxu1 %v590_v19 }
  0x42   :  { %192 = vmatpush1.bf16.msra.mxu0 %v475_v14 }
  0x43   :  { %193 = vmatprep.subr.bf16.mxu0 %v476_v15 }
  0x44   :  { %435 = vmatpush3.bf16.msra.mxu1 %v485_v24 }
  0x45   :  { %436 = vmatprep.subr.bf16.mxu1 %v590_v19 }
  0x46   :  { %194 = vmatpush1.bf16.msra.mxu0 %v478_v16 }
  0x48   :  { %437 = vmatpush3.bf16.msra.mxu1 %v486_v25 }
  0x49   :  { %212 = vmatmul.mubr.bf16.vlgmr.msra.gmra.mxu0 %v479_v17  ;;  %438 = vmatprep.subr.bf16.mxu1 %v590_v19 }
  0x4c   :  { %439 = vmatpush3.bf16.msra.mxu1 %v487_v26 }
 0x109   :  { %v213_v32 = vpop.f32.mrf.mxu0 }
 0x10a   :  { %v214_v33 = vadd.f32 %v213_v32, %v86_v31 }
 0x10b   :  { %v215_v34 = vpop.f32.mrf.mxu0 }
 0x10c   :  { %v404_v35 = vmul.f32 -1.442695, %v214_v33  ;;  %v216_v49 = vadd.f32 %v215_v34, %v90_v45 }
 0x10d   :  { %v217_v36 = vpop.f32.mrf.mxu0 }
 0x10e   :  { %488 = vpow2.f32 %v404_v35  ;;  %v218_v37 = vadd.f32 %v217_v36, %v86_v31 }
 0x10f   :  { %v219_v46 = vpop.f32.mrf.mxu0 }
 0x110   :  { %v405_v38 = vmul.f32 -1.442695, %v218_v37  ;;  %v220_v51 = vadd.f32 %v219_v46, %v90_v45 }
 0x112   :  { %490 = vpow2.f32 %v405_v38 }
 0x11b   :  { %v489_v39 = vpop.eup %488 }
 0x11c   :  { %v228_v40 = vadd.f32 1.0, %v489_v39 }
 0x11e   :  { %492 = vrcp.f32 %v228_v40 }
 0x11f   :  { %v491_v41 = vpop.eup %490 }
 0x120   :  { %v229_v42 = vadd.f32 1.0, %v491_v41 }
 0x122   :  { %494 = vrcp.f32 %v229_v42 }
 0x12b   :  { %v493_v44 = vpop.eup %492 }
 0x12c   :  { %v234_v47 = vmul.f32 %v493_v44, %v214_v33 }
 0x12e   :  { %v236_v52 = vmul.f32 %v234_v47, %v216_v49 }
 0x12f   :  { %v495_v48 = vpop.eup %494 }
 0x130   :  { %v235_v50 = vmul.f32 %v495_v48, %v218_v37 }
 0x132   :  { %v237_v53 = vmul.f32 %v235_v50, %v220_v51 }
 0x134   :  { %v238_v54 = vpack.c.bf16 %v237_v53, %v236_v52 }
 0x136   :  { %441 = vmatmul.mubr.bf16.vlgmr.msra.gmra.mxu1 %v238_v54 }
 0x1f6   :  { %v337_v56 = vpop.f32.mrf.mxu1 }
 0x1f7   :  { %v355_v57 = vadd.f32 %v414_v55, %v337_v56 }
 0x1f8   :  { %v442_v58 = vpop.f32.mrf.mxu1 }
 0x1f9   :  { %357 = vst [vmem:[#allocation8] sm:$0xff] %v355_v57 }
 0x1fa   :  { %v340_v59 = vpop.f32.mrf.mxu1 }
 0x1fb   :  { %v356_v60 = vadd.f32 %v414_v55, %v340_v59 }
 0x1fc   :  { %v443_v61 = vpop.f32.mrf.mxu1 }
 0x1fd   :  { %358 = vst [vmem:[#allocation8 + $0x8] sm:$0xff] %v356_v60 }
 0x1fe   :  { %567 = shalt.err (!%p564_p5)
}
 0x1ff   :  { %380 = dma.vmem_to_hbm [thread:$0]  %s375_s13, 256, %s652_s5, [#allocation4], %s583_s21, %s583_s21, %s584_s22  }
 0x200   :  { %580 = dma.done.wait [#allocation4], 256  }
 0x201   :  { %581 = vsyncadd [#allocation4], 4294967040 }
 0x202   :  { %384 = vsyncpa [#allocation3], 1 }
 0x203   :  { %385 = vsyncpa [#allocation6], 1 }
 0x204   :  { %386 = vsyncpa [#allocation4], 1 }

</bundles_post_ra>
